<compile_context>
chip_gen: v5e
topology: v5e:2x2
jax: 0.10.0
libtpu: 0.0.40
codegen_flags: <defaults>
</compile_context>

<pallas_src>
import jax
import jax.numpy as jnp
import numpy as np
from jax import lax
from jax.experimental import pallas as pl
from jax.experimental.pallas import tpu as pltpu


# ---------------------------------------------------------------------------
# Helpers
# ---------------------------------------------------------------------------
def _vmem_capacity_bytes():
    """Physical VMEM per TensorCore; conservative fallback if query fails."""
    try:
        return int(pltpu.get_tpu_info().vmem_capacity_bytes)
    except Exception:
        return 64 * 1024 * 1024  # v7x per-core VMEM (most restrictive)


def _pick_row_tile(batch, max_tile):
    """Largest multiple-of-8 divisor of `batch` that is <= max_tile."""
    for tb in (128, 64, 32, 16, 8):
        if tb <= max_tile and tb <= batch and batch % tb == 0:
            return tb
    return batch  # block equals full batch dim -> always a legal block shape


# ---------------------------------------------------------------------------
# Path A kernel: table resident (untiled) in VMEM, per-row dynamic-slice copy.
# ---------------------------------------------------------------------------
def _embed_vmem_gather_kernel(ids_ref, table_ref, o_ref):
    # ids_ref  : (B,) int32 in SMEM (scalar prefetch)
    # table_ref: (N, D) full table, resident in VMEM (single copy)
    # o_ref    : (TB, D) output row-tile for this grid step
    tb = o_ref.shape[0]
    base = pl.program_id(0) * tb

    def body(k, carry):
        idx = ids_ref[base + k]
        o_ref[pl.ds(k, 1), :] = table_ref[pl.ds(idx, 1), :]
        return carry

    lax.fori_loop(0, tb, body, 0)


# ---------------------------------------------------------------------------
# Public wrapper
# ---------------------------------------------------------------------------
def surgeon_embedding(surgeon_id, embed_table, *, vmem_table_budget_bytes=None):
    """Pallas equivalent of nn.Embedding(num_surgeons, hidden_dim)(surgeon_id)."""
    batch = surgeon_id.shape[0]
    num_rows, dim = embed_table.shape
    itemsize = jnp.dtype(embed_table.dtype).itemsize
    table_bytes = int(num_rows) * int(dim) * itemsize

    capacity = _vmem_capacity_bytes()
    if vmem_table_budget_bytes is None:
        # Generation-aware budget for the resident table:
        #   ~1/4 of physical VMEM (16 MiB on v7x's 64 MiB, 32 MiB on
        #   v5e/v6e's 128 MiB), capped at 48 MiB.
        vmem_table_budget_bytes = min(capacity // 4, 48 * 1024 * 1024)

    # Clamp ids so an out-of-range id cannot trigger an out-of-bounds DMA.
    ids = jnp.clip(surgeon_id.astype(jnp.int32), 0, num_rows - 1)

    # ---- routing: VMEM fit AND HBM traffic ---------------------------------
    fits_vmem = table_bytes <= vmem_table_budget_bytes
    # Path A streams the whole table from HBM once; Path B issues `batch`
    # tiny row DMAs from a deep ring (~0.5 us/row budget incl. issue+latency).
    hbm_bytes_per_us = 1.0e6  # ~1 TB/s, conservative mid-generation figure
    path_a_us = table_bytes / hbm_bytes_per_us
    path_b_us = batch * 0.5
    use_path_a = fits_vmem and (path_a_us <= path_b_us or batch >= num_rows)

    out_shape = jax.ShapeDtypeStruct((batch, dim), embed_table.dtype)

    if use_path_a:
        # ---- Path A: resident table, per-row VMEM copy ---------------------
        tb = _pick_row_tile(batch, max_tile=128)
        grid = (batch // tb,)
        need = table_bytes + 2 * tb * dim * itemsize + (1 << 20)
        vmem_limit = int(min(capacity * 3 // 4, max(need, 16 * 1024 * 1024)))

        grid_spec = pltpu.PrefetchScalarGridSpec(
            num_scalar_prefetch=1,            # ids -> SMEM before the grid
            grid=grid,
            in_specs=[
                # Untiled VMEM placement: table copied into VMEM once, NOT
                # double-buffered by the pipeline.
                pl.BlockSpec(memory_space=pltpu.MemorySpace.VMEM),
            ],
            out_specs=pl.BlockSpec((tb, dim), lambda i, ids_ref: (i, 0)),
        )
        return pl.pallas_call(
            _embed_vmem_gather_kernel,
            out_shape=out_shape,
            grid_spec=grid_spec,
            compiler_params=pltpu.CompilerParams(
                dimension_semantics=("parallel",),   # megacore split on v7x
                vmem_limit_bytes=vmem_limit,
            ),
        )(ids, embed_table)

    # ---- Path B: table stays in HBM, manual deep-ring DMA row gather -------
    tb = _pick_row_tile(batch, max_tile=64)   # rows gathered per grid step
    grid = (batch // tb,)
    ring = min(8, tb)                         # DMA semaphore ring depth
    need = 2 * tb * dim * itemsize + (1 << 20)
    vmem_limit = int(min(capacity * 3 // 4, max(need, 16 * 1024 * 1024)))

    def dma_gather_kernel(ids_ref, table_hbm_ref, o_ref, dma_sems):
        # ids_ref      : (B,) int32 in SMEM (scalar prefetch)
        # table_hbm_ref: (N, D) raw HBM ref (memory_space=pl.ANY)
        # o_ref        : (TB, D) output row-tile in VMEM (DMA destination)
        # dma_sems     : (ring,) DMA semaphores
        base = pl.program_id(0) * tb

        def row_copy(row, table_row):
            return pltpu.make_async_copy(
                table_hbm_ref.at[pl.ds(table_row, 1), :],
                o_ref.at[pl.ds(row, 1), :],
                dma_sems.at[row % ring],
            )

        for r in range(tb):
            if r >= ring:
                # Free this semaphore slot: wait for the DMA issued `ring`
                # rows ago (same dst shape, so the descriptor matches).
                row_copy(r - ring, 0).wait()
            row_copy(r, ids_ref[base + r]).start()
        # Drain the remaining in-flight DMAs before the output block is
        # written back to HBM.
        for r in range(max(tb - ring, 0), tb):
            row_copy(r, 0).wait()

    grid_spec = pltpu.PrefetchScalarGridSpec(
        num_scalar_prefetch=1,
        grid=grid,
        in_specs=[pl.BlockSpec(memory_space=pl.ANY)],   # table stays in HBM
        out_specs=pl.BlockSpec((tb, dim), lambda i, ids_ref: (i, 0)),
        scratch_shapes=[pltpu.SemaphoreType.DMA((ring,))],
    )
    return pl.pallas_call(
        dma_gather_kernel,
        out_shape=out_shape,
        grid_spec=grid_spec,
        compiler_params=pltpu.CompilerParams(
            dimension_semantics=("parallel",),
            vmem_limit_bytes=vmem_limit,
        ),
    )(ids, embed_table)


if __name__ == "__main__":
    num_surgeons = 24
    hidden_dim = 32
    batch = 8

    key = jax.random.PRNGKey(0)
    k_w, k_t = jax.random.split(key)

    # Deterministic parameter init (nn.Embedding default: N(0, 1)).
    embed_table = jax.random.normal(
        k_w, (num_surgeons, hidden_dim), dtype=jnp.float32)
    surgeon_id = jax.random.randint(
        k_t, (batch,), 0, num_surgeons, dtype=jnp.int32)

    ref = embed_table[surgeon_id]

    # Path A (default routing): table resident once in VMEM, in-kernel gather.
    out_a = jax.block_until_ready(surgeon_embedding(surgeon_id, embed_table))
    np.testing.assert_allclose(np.asarray(out_a), np.asarray(ref),
                               rtol=0, atol=0)

    # Path B (forced): HBM table + manual deep-ring DMA row gather.
    out_b = jax.block_until_ready(
        surgeon_embedding(surgeon_id, embed_table, vmem_table_budget_bytes=0))
    np.testing.assert_allclose(np.asarray(out_b), np.asarray(ref),
                               rtol=0, atol=0)

    print("KERNEL_OK")
</pallas_src>

<mosaic_0001>
module attributes {stable_mosaic.version = 11 : i64} {
  func.func @_embed_vmem_gather_kernel(%arg0: i32, %arg1: memref<8xi32, #tpu.memory_space<smem>>, %arg2: memref<24x32xf32, #tpu.memory_space<vmem>>, %arg3: memref<8x32xf32, #tpu.memory_space<vmem>>) attributes {dimension_semantics = [#tpu.dimension_semantics<parallel>], iteration_bounds = array<i64: 1>, scalar_prefetch = 1 : i64, scratch_operands = 0 : i64, tpu.core_type = #tpu.core_type<tc>, window_params = [{pipeline_mode = #tpu.pipeline_mode<synchronous>, transform_indices = @transform_0, window_bounds = array<i64: 24, 32>}, {transform_indices = @transform_1, window_bounds = array<i64: 8, 32>}]} {
    %c8_i32 = arith.constant 8 : i32
    %0 = arith.muli %arg0, %c8_i32 : i32
    %c0_i32 = arith.constant 0 : i32
    %c8_i32_0 = arith.constant 8 : i32
    %1 = arith.addi %c0_i32, %c8_i32_0 : i32
    %c1_i32 = arith.constant 1 : i32
    scf.for %arg4 = %c0_i32 to %1 step %c1_i32  : i32 {
      %2 = arith.addi %0, %arg4 : i32
      %3 = arith.index_cast %2 : i32 to index
      %4 = memref.load %arg1[%3] : memref<8xi32, #tpu.memory_space<smem>>
      %5 = arith.index_cast %4 : i32 to index
      %c0 = arith.constant 0 : index
      %6 = vector.load %arg2[%5, %c0] : memref<24x32xf32, #tpu.memory_space<vmem>>, vector<1x32xf32>
      %7 = arith.index_cast %arg4 : i32 to index
      %c0_2 = arith.constant 0 : index
      %8 = vector.load %arg3[%7, %c0_2] : memref<8x32xf32, #tpu.memory_space<vmem>>, vector<1x32xf32>
      tpu.vector_store %arg3[%7, %c0_2], %6 {strides = array<i32>} : memref<8x32xf32, #tpu.memory_space<vmem>>, vector<1x32xf32>,
    }
    %c8_i32_1 = arith.constant 8 : i32
    return
  }
  func.func @transform_0(%arg0: i32, %arg1: memref<8xi32, #tpu.memory_space<smem>>) -> (i32, i32) {
    %c0_i32 = arith.constant 0 : i32
    %c0_i32_0 = arith.constant 0 : i32
    %c0_i32_1 = arith.constant 0 : i32
    return %c0_i32, %c0_i32_0 : i32, i32
  }
  func.func @transform_1(%arg0: i32, %arg1: memref<8xi32, #tpu.memory_space<smem>>) -> (i32, i32) {
    %c0_i32 = arith.constant 0 : i32
    %c0_i32_0 = arith.constant 0 : i32
    return %arg0, %c0_i32 : i32, i32
  }
}

</mosaic_0001>

<bundles_post_ra>
// kernel: tpu_custom_call.1
= control target key start
LH: loop header
LB: loop body
LE: loop exit
PB: predicated region body
PF: predicated region fallthrough
CT: control target
= control target key end

     0   :  { %s159_s12 = smov [#allocation3]   ;;  %s188_s0 = inlined_call_operand.hbm [shape: s32[8], index: 0, kind: input, shape index: {}]   ;;  %s189_s1 = inlined_call_operand.hbm [shape: f32[24,32], index: 1, kind: input, shape index: {}]   ;;  %s190_s2 = inlined_call_operand.hbm [shape: f32[8,32], index: 2, kind: output, shape index: {}]  }
   0x1   :  { %s8_s11 = sshll.u32 %s188_s0, 4  ;;  %s9_s11 = int_to_ptr.hbm [resolvable:$true] %s8_s11 }
   0x2   :  { %11 = dma.hbm_to_smem %s9_s11, 16, %s159_s12, [#allocation2] }
   0x3   :  { %149 = dma.done.wait [#allocation2], 16 }
   0x4   :  { %150 = vsyncadd [#allocation2], 4294967280 }
   0x5   :  { %14 = sfence }
   0x6   :  { %15 = vsyncpa [#allocation5], 0 }
   0x7   :  { %16 = vsyncpa [#allocation6], 0  ;;  %s21_s15 = sshll.u32 %s189_s1, 4  ;;  %s160_s16 = smov [#allocation4]   ;;  %s22_s15 = int_to_ptr.hbm [resolvable:$true] %s21_s15 }
   0x8   :  { %s23_s17 = sshll.u32 %s160_s16, 4  ;;  %s161_s18 = smov 128   ;;  %s24_s17 = int_to_ptr.vmem [resolvable:$true] %s23_s17 }
   0x9   :  { %s162_s19 = smov 8  }
   0xa   :  { %29 = dma.hbm_to_vmem [thread:$0]  %s22_s15, 384, %s24_s17, [#allocation5], %s161_s18, %s161_s18, %s162_s19  }
   0xb   :  { %151 = dma.done.wait [#allocation5], 384  }
   0xc   :  { %152 = vsyncadd [#allocation5], 4294966912  ;;  %s155_s0 = smov 0  }
   0xd LB: > { %s42_s20 = sld [smem:[#allocation3 + %s157_s0]]  ;;  %vm46_vm0 = vcmask 253952   ;;  %s45_s22 = scalar_lea.vmem [#allocation7], %s157_s0  ;;  %s157_s0 = sphi %s155_s0, %s40_s0  }
   0xe   : > { %s40_s0 = sadd.s32 1, %s157_s0  }
   0xf   : > { %p37_p0 = scmp.ge.s32.totalorder %s40_s0, 8  }
  0x10   :  { %s55_s24 = sshll.u32 (%p37_p0), %s190_s2, 4  ;;  %s163_s25 = smov (%p37_p0), [#allocation7]   ;;  %s56_s24 = int_to_ptr.hbm [resolvable:$true] %s55_s24 }
  0x11   :  { %39 = sbr.rel (!%p37_p0) target bundleno = 13 (0xd), region = 37  ;;  %s53_s26 = sshll.u32 (%p37_p0), %s163_s25, 4  ;;  %s54_s26 = int_to_ptr.vmem [resolvable:$true] %s53_s26 }
  0x13   : > { %s43_s21 = scalar_lea.vmem [#allocation4], %s42_s20 }
  0x14   : > { %v44_v0 = vld [vmem:[%s43_s21] sm:$0x1] }
  0x15   : > { %47 = vst.msk [vmem:[%s45_s22] sm:$0x1] %vm46_vm0, %v44_v0 }
  0x16   :  { %58 = dma.vmem_to_hbm [thread:$0]  %s54_s26, 128, %s56_s24, [#allocation6]  }
  0x17   :  { %153 = dma.done.wait [#allocation6], 128  }
  0x18   :  { %154 = vsyncadd [#allocation6], 4294967168 }
  0x19   :  { %63 = vsyncpa [#allocation5], 1 }
  0x1a   :  { %64 = vsyncpa [#allocation6], 1 }

</bundles_post_ra>
